<compile_context>
chip_gen: v6e
topology: v6e:2x2x1
jax: 0.10.0
libtpu: 0.0.40
codegen_flags: <defaults>
</compile_context>

<pallas_src>
import functools
import string

import jax
import jax.numpy as jnp
from jax import lax
from jax.experimental import pallas as pl
from jax.experimental.pallas import tpu as pltpu


def _round_up(v, m):
    return (v + m - 1) // m * m


def _pick_time_chunk(T, max_tt=16):
    """Largest divisor of T that is <= max_tt (inner unrolled loop length)."""
    for tt in range(min(T, max_tt), 0, -1):
        if T % tt == 0:
            return tt
    return 1


# ---------------------------------------------------------------------------
# Phase A: batched x-projection (non-recurrent part, hoisted off serial path)
# ---------------------------------------------------------------------------
def _xproj_kernel(x_ref, w_ref, b_ref, gx_ref, lx_ref, *, three_h):
    # One (T*B, 128) @ (128, 3H+128) MXU pass feeding T*B rows at once.
    y = jnp.dot(x_ref[...], w_ref[...], preferred_element_type=jnp.float32)
    y = y + b_ref[...]
    gx_ref[...] = y[:, :three_h]   # GRU gate pre-activations (x part + fused biases)
    lx_ref[...] = y[:, three_h:]   # i2o logits x part + b_io (pad lanes = -1e30)


# ---------------------------------------------------------------------------
# Phase B: sequential GRU recurrence, time-chunked
# ---------------------------------------------------------------------------
def _gru_recurrence_kernel(gx_ref, h0_ref, wh_ref, bhn_ref,
                           hprev_ref, hfin_ref, h_carry,
                           *, hidden_size, tt):
    H = hidden_size

    @pl.when(pl.program_id(0) == 0)
    def _():
        h_carry[...] = h0_ref[...]

    # Hoisted out of the inner loop (JAX does not CSE broadcasts/loads).
    wh = wh_ref[...]        # (H, 3H)
    bhn = bhn_ref[...]      # (1, H)

    def step(i, h):
        # h is h_{t-1}; the batched output head (phase C) needs it -> store it.
        hprev_ref[i] = h
        y = gx_ref[i] + jnp.dot(h, wh, preferred_element_type=jnp.float32)
        r = jax.nn.sigmoid(y[:, 0:H])
        z = jax.nn.sigmoid(y[:, H:2 * H])
        n = jnp.tanh(y[:, 2 * H:3 * H] + r * bhn)
        return (1.0 - z) * n        # h_t = (1-z)*n + z*0   (hx == 0)

    h = lax.fori_loop(0, tt, step, h_carry[...], unroll=True)
    h_carry[...] = h                # carry across grid steps (chunks)
    hfin_ref[...] = h               # final hidden (constant-index output block)


# ---------------------------------------------------------------------------
# Phase C: batched output head (i2o hidden part + log_softmax, all timesteps)
# ---------------------------------------------------------------------------
def _output_head_kernel(lx_ref, hprev_ref, wh_io_ref, o_ref):
    logits = lx_ref[...] + jnp.dot(hprev_ref[...], wh_io_ref[...],
                                   preferred_element_type=jnp.float32)
    # Pad lanes carry a -1e30 bias (and zero weight columns), so exp() of them
    # is exactly 0 and the normalization over the 128 lanes is exact.
    m = jnp.max(logits, axis=1, keepdims=True)
    shifted = logits - m
    lse = jnp.log(jnp.sum(jnp.exp(shifted), axis=1, keepdims=True))
    o_ref[...] = shifted - lse


def gru_rnn_forward(x_seq, hidden, params):
    """x_seq: (T, B, I) one-hot chars; hidden: (B, H) initial hidden state.
    Returns (log_probs (T, B, O), final_hidden (B, H))."""
    T, B, I = x_seq.shape
    H = params["hidden_size"]
    O = params["output_size"]
    in_pad = params["in_pad"]
    out_pad = params["out_pad"]

    # Lane-pad the one-hot inputs once for the whole sequence (57 -> 128).
    x_pad = jnp.zeros((T, B, in_pad), jnp.float32).at[:, :, :I].set(x_seq)
    x_flat = x_pad.reshape(T * B, in_pad)

    # ---- Phase A: batched x projection (whole-array blocks, tiny sizes) ----
    gx_flat, lx_flat = pl.pallas_call(
        functools.partial(_xproj_kernel, three_h=3 * H),
        out_shape=(jax.ShapeDtypeStruct((T * B, 3 * H), jnp.float32),
                   jax.ShapeDtypeStruct((T * B, out_pad), jnp.float32)),
    )(x_flat, params["wx_fused"], params["bx_fused"])
    gx = gx_flat.reshape(T, B, 3 * H)

    # ---- Phase B: sequential recurrence, TT timesteps per grid step ----
    TT = _pick_time_chunk(T)
    rec_kernel = functools.partial(_gru_recurrence_kernel, hidden_size=H, tt=TT)
    hprev, h_final = pl.pallas_call(
        rec_kernel,
        grid=(T // TT,),
        in_specs=[
            pl.BlockSpec((TT, B, 3 * H), lambda i: (i, 0, 0)),  # gx chunk (streamed)
            pl.BlockSpec((B, H), lambda i: (0, 0)),             # h0        (resident)
            pl.BlockSpec((H, 3 * H), lambda i: (0, 0)),         # Wh_gru    (resident)
            pl.BlockSpec((1, H), lambda i: (0, 0)),             # b_hh_n    (resident)
        ],
        out_specs=(
            pl.BlockSpec((TT, B, H), lambda i: (i, 0, 0)),      # h_{t-1} per step
            pl.BlockSpec((B, H), lambda i: (0, 0)),             # final hidden
        ),
        out_shape=(jax.ShapeDtypeStruct((T, B, H), jnp.float32),
                   jax.ShapeDtypeStruct((B, H), jnp.float32)),
        scratch_shapes=[pltpu.VMEM((B, H), jnp.float32)],       # hidden-state carry
        compiler_params=pltpu.CompilerParams(
            dimension_semantics=("arbitrary",)),  # time is sequential — never parallel
    )(gx, hidden, params["wh_gru"], params["b_hh_n"])

    # ---- Phase C: batched output head + log_softmax ----
    out_flat = pl.pallas_call(
        _output_head_kernel,
        out_shape=jax.ShapeDtypeStruct((T * B, out_pad), jnp.float32),
    )(lx_flat, hprev.reshape(T * B, H), params["wh_io"])

    out = out_flat.reshape(T, B, out_pad)[:, :, :O]
    return out, h_final


def init_params(key, input_size, hidden_size, output_size):
    """PyTorch-default uniform init, packed into the split-K kernel layout."""
    I, H, O = input_size, hidden_size, output_size
    in_dim = I + H
    k_gru = 1.0 / (H ** 0.5)
    k_lin = 1.0 / (in_dim ** 0.5)
    ks = jax.random.split(key, 5)
    w_ih = jax.random.uniform(ks[0], (3 * H, in_dim), jnp.float32, -k_gru, k_gru)
    b_ih = jax.random.uniform(ks[1], (3 * H,), jnp.float32, -k_gru, k_gru)
    b_hh = jax.random.uniform(ks[2], (3 * H,), jnp.float32, -k_gru, k_gru)
    w_io = jax.random.uniform(ks[3], (O, in_dim), jnp.float32, -k_lin, k_lin)
    b_io = jax.random.uniform(ks[4], (O,), jnp.float32, -k_lin, k_lin)
    # NOTE: GRUCell.weight_hh is mathematically unused (hx defaults to zeros,
    # so W_hh @ 0 == 0); only its bias b_hh survives.

    in_pad = _round_up(I, 128)       # 57  -> 128
    out_pad = _round_up(O, 128)      # 18  -> 128
    N = 3 * H + out_pad              # 512 fused columns for the x projection

    w_ih_t = w_ih.T                  # (in_dim, 3H)
    w_io_t = w_io.T                  # (in_dim, O)

    # x-half of the weights, fused [gates | logits] along columns.
    wx = jnp.zeros((in_pad, N), jnp.float32)
    wx = wx.at[:I, 0:3 * H].set(w_ih_t[:I])
    wx = wx.at[:I, 3 * H:3 * H + O].set(w_io_t[:I])
    # (Optional on v6e/v7x: cast wx / wh_* to bf16; gate math stays f32.)

    bx = jnp.zeros((N,), jnp.float32)
    bx = bx.at[0:2 * H].set(b_ih[0:2 * H] + b_hh[0:2 * H])   # fold b_hh_{r,z}
    bx = bx.at[2 * H:3 * H].set(b_ih[2 * H:3 * H])
    bx = bx.at[3 * H:3 * H + O].set(b_io)
    bx = bx.at[3 * H + O:].set(-1e30)                        # mask pad logit lanes

    # h-half of the weights: kept separate so the recurrence dot has K = H = 128.
    wh_gru = w_ih_t[I:]                                               # (H, 3H)
    wh_io = jnp.zeros((H, out_pad), jnp.float32).at[:, :O].set(w_io_t[I:])

    return {
        "hidden_size": H,
        "output_size": O,
        "in_pad": in_pad,
        "out_pad": out_pad,
        "wx_fused": wx,
        "bx_fused": bx[None, :],
        "wh_gru": wh_gru,
        "wh_io": wh_io,
        "b_hh_n": b_hh[2 * H:3 * H][None, :],
        # raw PyTorch-layout params, kept only for the pure-JAX reference.
        "_raw": (w_ih, b_ih, b_hh, w_io, b_io),
    }


def gru_rnn_reference(x_seq, hidden, params):
    """Pure-JAX per-character loop mirroring the PyTorch module exactly."""
    w_ih, b_ih, b_hh, w_io, b_io = params["_raw"]
    H = params["hidden_size"]
    h = hidden
    outs = []
    for t in range(x_seq.shape[0]):
        comb = jnp.concatenate([x_seq[t], h], axis=1)
        gi = comb @ w_ih.T + b_ih
        gh = b_hh                                    # W_hh @ 0 + b_hh
        r = jax.nn.sigmoid(gi[:, 0:H] + gh[0:H])
        z = jax.nn.sigmoid(gi[:, H:2 * H] + gh[H:2 * H])
        n = jnp.tanh(gi[:, 2 * H:] + r * gh[2 * H:])
        h = (1.0 - z) * n
        outs.append(jax.nn.log_softmax(comb @ w_io.T + b_io, axis=1))
    return jnp.stack(outs), h


if __name__ == "__main__":
    n_hidden = 128
    all_letters = string.ascii_letters + " .,;'"
    n_letters = len(all_letters)          # 57
    n_categories = 18                     # classic tutorial value

    key = jax.random.PRNGKey(0)
    params = init_params(key, n_letters, n_hidden, n_categories)

    # lineToTensor('Albert'): (seq_len, 1, n_letters) one-hot characters.
    name = "Albert"
    x_seq = jnp.zeros((len(name), 1, n_letters), jnp.float32)
    for t, ch in enumerate(name):
        x_seq = x_seq.at[t, 0, all_letters.find(ch)].set(1.0)
    hidden0 = jnp.zeros((1, n_hidden), jnp.float32)   # initHidden()

    out, new_hidden = gru_rnn_forward(x_seq, hidden0, params)
    jax.block_until_ready((out, new_hidden))

    assert out.shape == (len(name), 1, n_categories)
    assert new_hidden.shape == (1, n_hidden)
    # log_softmax sanity: per-step probabilities sum to 1
    assert float(jnp.max(jnp.abs(jnp.sum(jnp.exp(out), axis=-1) - 1.0))) < 1e-4
    # match the pure-JAX / PyTorch-style reference loop
    out_expected, hid_expected = gru_rnn_reference(x_seq, hidden0, params)
    assert float(jnp.max(jnp.abs(out - out_expected))) < 2e-2
    assert float(jnp.max(jnp.abs(new_hidden - hid_expected))) < 2e-2
    print("KERNEL_OK")
</pallas_src>

<mosaic_0001>
module attributes {stable_mosaic.version = 11 : i64} {
  func.func @_xproj_kernel(%arg0: memref<6x128xf32, #tpu.memory_space<vmem>>, %arg1: memref<128x512xf32, #tpu.memory_space<vmem>>, %arg2: memref<1x512xf32, #tpu.memory_space<vmem>>, %arg3: memref<6x384xf32, #tpu.memory_space<vmem>>, %arg4: memref<6x128xf32, #tpu.memory_space<vmem>>) attributes {dimension_semantics = [], scalar_prefetch = 0 : i64, scratch_operands = 0 : i64, tpu.core_type = #tpu.core_type<tc>} {
    %c0 = arith.constant 0 : index
    %c0_0 = arith.constant 0 : index
    %0 = vector.load %arg0[%c0, %c0_0] : memref<6x128xf32, #tpu.memory_space<vmem>>, vector<6x128xf32>
    %c0_1 = arith.constant 0 : index
    %c0_2 = arith.constant 0 : index
    %1 = vector.load %arg1[%c0_1, %c0_2] : memref<128x512xf32, #tpu.memory_space<vmem>>, vector<128x512xf32>
    %cst = arith.constant dense<0.000000e+00> : vector<6x512xf32>
    %2 = tpu.matmul %0, %1, %cst {dimension_numbers = #tpu.dot_dimension_numbers<[1], [0], [0], [1], [0, 0, 1, 1], [], []>} : vector<6x128xf32>, vector<128x512xf32>, vector<6x512xf32> -> vector<6x512xf32>
    %c0_3 = arith.constant 0 : index
    %c0_4 = arith.constant 0 : index
    %3 = vector.load %arg2[%c0_3, %c0_4] : memref<1x512xf32, #tpu.memory_space<vmem>>, vector<1x512xf32>
    %4 = vector.broadcast %3 : vector<1x512xf32> to vector<6x512xf32>
    %5 = arith.addf %2, %4 : vector<6x512xf32>
    %6 = vector.extract_strided_slice %5 {offsets = [0, 0], sizes = [6, 384], strides = [1, 1]} : vector<6x512xf32> to vector<6x384xf32>
    %c0_5 = arith.constant 0 : index
    %c0_6 = arith.constant 0 : index
    %7 = vector.load %arg3[%c0_5, %c0_6] : memref<6x384xf32, #tpu.memory_space<vmem>>, vector<6x384xf32>
    tpu.vector_store %arg3[%c0_5, %c0_6], %6 {strides = array<i32>} : memref<6x384xf32, #tpu.memory_space<vmem>>, vector<6x384xf32>,
    %8 = vector.extract_strided_slice %5 {offsets = [0, 384], sizes = [6, 128], strides = [1, 1]} : vector<6x512xf32> to vector<6x128xf32>
    %c0_7 = arith.constant 0 : index
    %c0_8 = arith.constant 0 : index
    %9 = vector.load %arg4[%c0_7, %c0_8] : memref<6x128xf32, #tpu.memory_space<vmem>>, vector<6x128xf32>
    tpu.vector_store %arg4[%c0_7, %c0_8], %8 {strides = array<i32>} : memref<6x128xf32, #tpu.memory_space<vmem>>, vector<6x128xf32>,
    return
  }
}

</mosaic_0001>

<bundles_post_ra>
// kernel: tpu_custom_call.1
= control target key start
LH: loop header
LB: loop body
LE: loop exit
PB: predicated region body
PF: predicated region fallthrough
CT: control target
= control target key end

     0   :  { %10 = vsyncpa [#allocation3], 0  ;;  %s482_s0 = inlined_call_operand.hbm [shape: f32[6,128], index: 0, kind: input, shape index: {}]   ;;  %s483_s1 = inlined_call_operand.hbm [shape: f32[128,512], index: 1, kind: input, shape index: {}]   ;;  %s484_s2 = inlined_call_operand.hbm [shape: f32[1,512], index: 2, kind: input, shape index: {}]   ;;  %s485_s3 = inlined_call_operand.hbm [shape: f32[6,384], index: 3, kind: output, shape index: {0}]   ;;  %s486_s4 = inlined_call_operand.hbm [shape: f32[6,128], index: 4, kind: output, shape index: {1}]  }
   0x1   :  { %11 = vsyncpa [#allocation6], 0 }
   0x2   :  { %12 = vsyncpa [#allocation4], 0 }
   0x3   :  { %13 = vsyncpa [#allocation10], 0  ;;  %s434_s15 = smov [#allocation5]  }
   0x4   :  { %s29_s16 = sshll.u32 %s434_s15, 4  ;;  %s30_s16 = int_to_ptr.vmem [resolvable:$true] %s29_s16 }
   0x5   :  { %s334_s17 = scalar_lea.vmem %s30_s16, 8192  ;;  %p339_p1 = scmp.lt.s32.totalorder %s30_s16, %s30_s16 }
   0x6   :  { %p335_p0 = scmp.ne.s32.totalorder %s30_s16, %s334_s17  ;;  %p340_p2 = scmp.lt.s32.totalorder %s334_s17, %s334_s17 }
   0x8   :  { %p341_p3 = por %p340_p2, %p339_p1 }
   0xa   :  { %p342_p4 = pnand %p341_p3, %p335_p0 }
   0xc   :  { %345 = shalt.err (!%p342_p4)
}
   0xd   :  { %s435_s18 = smov 512   ;;  %s436_s19 = smov 32  }
   0xe   :  { %35 = dma.hbm_to_vmem [thread:$0]  %s483_s1, 8192, %s30_s16, [#allocation6], %s435_s18, %s435_s18, %s436_s19  }
   0xf   :  { %s437_s22 = smov [#allocation2]   ;;  %s438_s24 = smov [#allocation7]  }
  0x10   :  { %s20_s23 = sshll.u32 %s437_s22, 4  ;;  %s42_s25 = sshll.u32 %s438_s24, 4  ;;  %s21_s23 = int_to_ptr.vmem [resolvable:$true] %s20_s23  ;;  %s43_s25 = int_to_ptr.vmem [resolvable:$true] %s42_s25 }
  0x11   :  { %s354_s26 = scalar_lea.vmem %s21_s23, 128  ;;  %p359_p6 = scmp.lt.s32.totalorder %s21_s23, %s21_s23 }
  0x12   :  { %p355_p5 = scmp.ne.s32.totalorder %s21_s23, %s354_s26  ;;  %p360_p7 = scmp.lt.s32.totalorder %s354_s26, %s354_s26 }
  0x14   :  { %p361_p8 = por %p360_p7, %p359_p6 }
  0x16   :  { %p362_p9 = pnand %p361_p8, %p355_p5 }
  0x18   :  { %365 = shalt.err (!%p362_p9)
}
  0x19   :  { %23 = dma.hbm_to_vmem [thread:$0]  %s482_s0, 128, %s21_s23, [#allocation3]  }
  0x1a   :  { %s374_s29 = scalar_lea.vmem %s43_s25, 64  ;;  %p379_p11 = scmp.lt.s32.totalorder %s43_s25, %s43_s25 }
  0x1b   :  { %p375_p10 = scmp.ne.s32.totalorder %s43_s25, %s374_s29  ;;  %p380_p12 = scmp.lt.s32.totalorder %s374_s29, %s374_s29 }
  0x1d   :  { %p381_p13 = por %p380_p12, %p379_p11 }
  0x1f   :  { %p382_p0 = pnand %p381_p13, %p375_p10 }
  0x21   :  { %385 = shalt.err (!%p382_p0)
}
  0x22   :  { %45 = dma.hbm_to_vmem [thread:$0]  %s484_s2, 64, %s43_s25, [#allocation6]  }
  0x23   :  { %426 = dma.done.wait [#allocation3], 128  }
  0x24   :  { %427 = vsyncadd [#allocation3], 4294967168 }
  0x25   :  { %428 = dma.done.wait [#allocation6], 8256  }
  0x26   :  { %429 = vsyncadd [#allocation6], 4294959040  ;;  %v439_v0 = vmov 0.0   ;;  %v117_v1 = vld [vmem:[#allocation5 + $0x1e8] sm:$0xff]  ;;  %v119_v2 = vld [vmem:[#allocation5 + $0x1f8] sm:$0xff]  ;;  %s440_s0 = smov [#allocation8]  }
  0x27   :  { %206 = vmatprep.mubr.f32.mxu0 %v439_v0  ;;  %277 = vmatprep.mubr.f32.mxu1 %v439_v0  ;;  %v116_v3 = vld [vmem:[#allocation5 + $0x1e0] sm:$0xff]  ;;  %v118_v4 = vld [vmem:[#allocation5 + $0x1f0] sm:$0xff]  ;;  %v113_v5 = vld [vmem:[#allocation5 + $0x1c8] sm:$0xff]  ;;  %s294_s2 = sshll.u32 %s440_s0, 4  ;;  %s441_s5 = smov [#allocation9]   ;;  %s295_s2 = int_to_ptr.vmem [resolvable:$true] %s294_s2 }
  0x28   :  { %142 = vmatprep.subr.mxu0 %v117_v1  ;;  %213 = vmatprep.subr.mxu1 %v119_v2  ;;  %v115_v6 = vld [vmem:[#allocation5 + $0x1d8] sm:$0xff]  ;;  %v112_v7 = vld [vmem:[#allocation5 + $0x1c0] sm:$0xff]  ;;  %v114_v8 = vld [vmem:[#allocation5 + $0x1d0] sm:$0xff]  ;;  %v122_v2 = vlaneseq  ;;  %s304_s6 = sshll.u32 %s441_s5, 4  ;;  %s386_s7 = scalar_lea.vmem %s295_s2, 384  ;;  %s305_s6 = int_to_ptr.vmem [resolvable:$true] %s304_s6 }
  0x29   :  { %143 = vmatpush1.msra.mxu0 %v116_v3  ;;  %214 = vmatpush1.msra.mxu1 %v118_v4  ;;  %v109_v9 = vld [vmem:[#allocation5 + $0x1a8] sm:$0xff]  ;;  %v111_v10 = vld [vmem:[#allocation5 + $0x1b8] sm:$0xff]  ;;  %v108_v11 = vld [vmem:[#allocation5 + $0x1a0] sm:$0xff]  ;;  %p387_p1 = scmp.ne.s32.totalorder %s295_s2, %s386_s7  ;;  %p391_p2 = scmp.lt.s32.totalorder %s295_s2, %s295_s2 }
  0x2a   :  { %144 = vmatprep.subr.mxu0 %v113_v5  ;;  %215 = vmatprep.subr.mxu1 %v115_v6  ;;  %v110_v12 = vld [vmem:[#allocation5 + $0x1b0] sm:$0xff]  ;;  %v105_v13 = vld [vmem:[#allocation5 + $0x188] sm:$0xff]  ;;  %v107_v14 = vld [vmem:[#allocation5 + $0x198] sm:$0xff]  ;;  %v123_v3 = vshrl.u32 %v122_v2, 7  ;;  %p392_p3 = scmp.lt.s32.totalorder %s386_s7, %s386_s7 }
  0x2b   :  { %145 = vmatpush1.msra.mxu0 %v112_v7  ;;  %216 = vmatpush1.msra.mxu1 %v114_v8  ;;  %v104_v15 = vld [vmem:[#allocation5 + $0x180] sm:$0xff]  ;;  %v106_v16 = vld [vmem:[#allocation5 + $0x190] sm:$0xff]  ;;  %v101_v17 = vld [vmem:[#allocation5 + $0x168] sm:$0xff] }
  0x2c   :  { %146 = vmatprep.subr.mxu0 %v109_v9  ;;  %217 = vmatprep.subr.mxu1 %v111_v10  ;;  %v103_v18 = vld [vmem:[#allocation5 + $0x178] sm:$0xff]  ;;  %v100_v19 = vld [vmem:[#allocation5 + $0x160] sm:$0xff]  ;;  %v102_v20 = vld [vmem:[#allocation5 + $0x170] sm:$0xff]  ;;  %v124_v4 = vsub.s32 0, %v123_v3  ;;  %v132_v5 = vsub.s32 2, %v123_v3  ;;  %v128_v7 = vsub.s32 1, %v123_v3  ;;  %p393_p4 = por %p392_p3, %p391_p2 }
  0x2d   :  { %147 = vmatpush1.msra.mxu0 %v108_v11  ;;  %218 = vmatpush1.msra.mxu1 %v110_v12  ;;  %v97_v21 = vld [vmem:[#allocation5 + $0x148] sm:$0xff]  ;;  %v99_v22 = vld [vmem:[#allocation5 + $0x158] sm:$0xff]  ;;  %v96_v23 = vld [vmem:[#allocation5 + $0x140] sm:$0xff]  ;;  %v136_v8 = vsub.s32 3, %v123_v3 }
  0x2e   :  { %148 = vmatprep.subr.mxu0 %v105_v13  ;;  %219 = vmatprep.subr.mxu1 %v107_v14  ;;  %v98_v24 = vld [vmem:[#allocation5 + $0x150] sm:$0xff]  ;;  %v93_v25 = vld [vmem:[#allocation5 + $0x128] sm:$0xff]  ;;  %v95_v26 = vld [vmem:[#allocation5 + $0x138] sm:$0xff]  ;;  %p394_p5 = pnand %p393_p4, %p387_p1 }
  0x2f   :  { %149 = vmatpush1.msra.mxu0 %v104_v15  ;;  %220 = vmatpush1.msra.mxu1 %v106_v16  ;;  %v92_v27 = vld [vmem:[#allocation5 + $0x120] sm:$0xff]  ;;  %v94_v28 = vld [vmem:[#allocation5 + $0x130] sm:$0xff]  ;;  %v89_v29 = vld [vmem:[#allocation5 + $0x108] sm:$0xff] }
  0x30   :  { %150 = vmatprep.subr.mxu0 %v101_v17  ;;  %221 = vmatprep.subr.mxu1 %v103_v18  ;;  %v91_v30 = vld [vmem:[#allocation5 + $0x118] sm:$0xff]  ;;  %v88_v31 = vld [vmem:[#allocation5 + $0x100] sm:$0xff]  ;;  %v90_v32 = vld [vmem:[#allocation5 + $0x110] sm:$0xff] }
  0x31   :  { %151 = vmatpush1.msra.mxu0 %v100_v19  ;;  %222 = vmatpush1.msra.mxu1 %v102_v20  ;;  %v85_v33 = vld [vmem:[#allocation5 + $0xe8] sm:$0xff]  ;;  %v87_v34 = vld [vmem:[#allocation5 + $0xf8] sm:$0xff]  ;;  %v84_v35 = vld [vmem:[#allocation5 + $0xe0] sm:$0xff] }
  0x32   :  { %152 = vmatprep.subr.mxu0 %v97_v21  ;;  %223 = vmatprep.subr.mxu1 %v99_v22  ;;  %v86_v36 = vld [vmem:[#allocation5 + $0xf0] sm:$0xff]  ;;  %v81_v37 = vld [vmem:[#allocation5 + $0xc8] sm:$0xff]  ;;  %v83_v38 = vld [vmem:[#allocation5 + $0xd8] sm:$0xff] }
  0x33   :  { %153 = vmatpush1.msra.mxu0 %v96_v23  ;;  %224 = vmatpush1.msra.mxu1 %v98_v24  ;;  %v80_v39 = vld [vmem:[#allocation5 + $0xc0] sm:$0xff]  ;;  %v82_v40 = vld [vmem:[#allocation5 + $0xd0] sm:$0xff]  ;;  %v77_v41 = vld [vmem:[#allocation5 + $0xa8] sm:$0xff] }
  0x34   :  { %154 = vmatprep.subr.mxu0 %v93_v25  ;;  %225 = vmatprep.subr.mxu1 %v95_v26  ;;  %v79_v42 = vld [vmem:[#allocation5 + $0xb8] sm:$0xff]  ;;  %v76_v43 = vld [vmem:[#allocation5 + $0xa0] sm:$0xff]  ;;  %v78_v44 = vld [vmem:[#allocation5 + $0xb0] sm:$0xff] }
  0x35   :  { %155 = vmatpush1.msra.mxu0 %v92_v27  ;;  %226 = vmatpush1.msra.mxu1 %v94_v28  ;;  %v73_v45 = vld [vmem:[#allocation5 + $0x88] sm:$0xff]  ;;  %v75_v46 = vld [vmem:[#allocation5 + $0x98] sm:$0xff]  ;;  %v72_v47 = vld [vmem:[#allocation5 + $0x80] sm:$0xff] }
  0x36   :  { %156 = vmatprep.subr.mxu0 %v89_v29  ;;  %227 = vmatprep.subr.mxu1 %v91_v30  ;;  %v74_v48 = vld [vmem:[#allocation5 + $0x90] sm:$0xff]  ;;  %v69_v49 = vld [vmem:[#allocation5 + $0x68] sm:$0xff]  ;;  %v71_v50 = vld [vmem:[#allocation5 + $0x78] sm:$0xff] }
  0x37   :  { %157 = vmatpush1.msra.mxu0 %v88_v31  ;;  %228 = vmatpush1.msra.mxu1 %v90_v32  ;;  %v68_v51 = vld [vmem:[#allocation5 + $0x60] sm:$0xff]  ;;  %v70_v52 = vld [vmem:[#allocation5 + $0x70] sm:$0xff]  ;;  %v65_v53 = vld [vmem:[#allocation5 + $0x48] sm:$0xff] }
  0x38   :  { %158 = vmatprep.subr.mxu0 %v85_v33  ;;  %229 = vmatprep.subr.mxu1 %v87_v34  ;;  %v67_v54 = vld [vmem:[#allocation5 + $0x58] sm:$0xff]  ;;  %v64_v55 = vld [vmem:[#allocation5 + $0x40] sm:$0xff]  ;;  %v66_v56 = vld [vmem:[#allocation5 + $0x50] sm:$0xff] }
  0x39   :  { %159 = vmatpush1.msra.mxu0 %v84_v35  ;;  %230 = vmatpush1.msra.mxu1 %v86_v36  ;;  %v61_v57 = vld [vmem:[#allocation5 + $0x28] sm:$0xff]  ;;  %v63_v58 = vld [vmem:[#allocation5 + $0x38] sm:$0xff]  ;;  %v60_v59 = vld [vmem:[#allocation5 + $0x20] sm:$0xff] }
  0x3a   :  { %160 = vmatprep.subr.mxu0 %v81_v37  ;;  %231 = vmatprep.subr.mxu1 %v83_v38  ;;  %v62_v60 = vld [vmem:[#allocation5 + $0x30] sm:$0xff]  ;;  %v57_v61 = vld [vmem:[#allocation5 + $0x8] sm:$0xff]  ;;  %v59_v62 = vld [vmem:[#allocation5 + $0x18] sm:$0xff] }
  0x3b   :  { %161 = vmatpush1.msra.mxu0 %v80_v39  ;;  %232 = vmatpush1.msra.mxu1 %v82_v40  ;;  %v56_v63 = vld [vmem:[#allocation5] sm:$0xff]  ;;  %v58_v0 = vld [vmem:[#allocation5 + $0x10] sm:$0xff]  ;;  %v55_v1 = vld [vmem:[#allocation2] sm:$0x3f] }
  0x3c   :  { %162 = vmatprep.subr.mxu0 %v77_v41  ;;  %233 = vmatprep.subr.mxu1 %v79_v42  ;;  %v120_v6 = vld [vmem:[#allocation7] sm:$0xf] }
  0x3d   :  { %163 = vmatpush1.msra.mxu0 %v76_v43  ;;  %234 = vmatpush1.msra.mxu1 %v78_v44  ;;  %v125_v9 = vrot.slane %v120_v6, %v124_v4  ;;  %v133_v10 = vrot.slane %v120_v6, %v132_v5  ;;  %v129_v11 = vrot.slane %v120_v6, %v128_v7 }
  0x3e   :  { %164 = vmatprep.subr.mxu0 %v73_v45  ;;  %235 = vmatprep.subr.mxu1 %v75_v46  ;;  %v137_v12 = vrot.slane %v120_v6, %v136_v8 }
  0x3f   :  { %165 = vmatpush1.msra.mxu0 %v72_v47  ;;  %236 = vmatpush1.msra.mxu1 %v74_v48 }
  0x40   :  { %166 = vmatprep.subr.mxu0 %v69_v49  ;;  %237 = vmatprep.subr.mxu1 %v71_v50 }
  0x41   :  { %167 = vmatpush1.msra.mxu0 %v68_v51  ;;  %238 = vmatpush1.msra.mxu1 %v70_v52 }
  0x42   :  { %168 = vmatprep.subr.mxu0 %v65_v53  ;;  %239 = vmatprep.subr.mxu1 %v67_v54 }
  0x43   :  { %169 = vmatpush1.msra.mxu0 %v64_v55  ;;  %240 = vmatpush1.msra.mxu1 %v66_v56 }
  0x44   :  { %170 = vmatprep.subr.mxu0 %v61_v57  ;;  %241 = vmatprep.subr.mxu1 %v63_v58 }
  0x45   :  { %171 = vmatpush1.msra.mxu0 %v60_v59  ;;  %242 = vmatpush1.msra.mxu1 %v62_v60 }
  0x46   :  { %172 = vmatprep.subr.mxu0 %v57_v61  ;;  %243 = vmatprep.subr.mxu1 %v59_v62 }
  0x47   :  { %173 = vmatpush1.msra.mxu0 %v56_v63  ;;  %244 = vmatpush1.msra.mxu1 %v58_v0 }
  0x48   :  { %207 = vmatmul.mubr.f32.vlgmr.msra.gmra.mxu0 %v55_v1  ;;  %278 = vmatmul.mubr.f32.vlgmr.msra.gmra.mxu1 %v55_v1 }
 0x108   :  { %v208_v13 = vpop.f32.mrf.mxu0  ;;  %v279_v14 = vpop.f32.mrf.mxu1 }
 0x109   :  { %v209_v15 = vadd.f32 %v208_v13, %v125_v9  ;;  %v280_v16 = vadd.f32 %v279_v14, %v133_v10 }
 0x10a   :  { %v210_v17 = vpop.f32.mrf.mxu0  ;;  %v281_v18 = vpop.f32.mrf.mxu1 }
 0x10b   :  { %284 = vst [vmem:[#allocation8] sm:$0x3f] %v209_v15  ;;  %286 = vst [vmem:[#allocation8 + $0x10] sm:$0x3f] %v280_v16  ;;  %v211_v19 = vadd.f32 %v210_v17, %v129_v11  ;;  %v282_v20 = vadd.f32 %v281_v18, %v137_v12 }
 0x10d   :  { %285 = vst [vmem:[#allocation8 + $0x8] sm:$0x3f] %v211_v19  ;;  %287 = vst [vmem:[#allocation9] sm:$0x3f] %v282_v20 }
 0x10e   :  { %397 = shalt.err (!%p394_p5)
}
 0x10f   :  { %297 = dma.vmem_to_hbm [thread:$0]  %s295_s2, 384, %s485_s3, [#allocation4]  }
 0x110   :  { %s406_s10 = scalar_lea.vmem %s305_s6, 128  ;;  %p411_p7 = scmp.lt.s32.totalorder %s305_s6, %s305_s6 }
 0x111   :  { %p407_p6 = scmp.ne.s32.totalorder %s305_s6, %s406_s10  ;;  %p412_p8 = scmp.lt.s32.totalorder %s406_s10, %s406_s10 }
 0x113   :  { %p413_p9 = por %p412_p8, %p411_p7 }
 0x115   :  { %p414_p10 = pnand %p413_p9, %p407_p6 }
 0x117   :  { %417 = shalt.err (!%p414_p10)
}
 0x118   :  { %307 = dma.vmem_to_hbm [thread:$0]  %s305_s6, 128, %s486_s4, [#allocation10]  }
 0x119   :  { %430 = dma.done.wait [#allocation4], 384  }
 0x11a   :  { %431 = vsyncadd [#allocation4], 4294966912 }
 0x11b   :  { %432 = dma.done.wait [#allocation10], 128  }
 0x11c   :  { %433 = vsyncadd [#allocation10], 4294967168 }
 0x11d   :  { %314 = vsyncpa [#allocation3], 1 }
 0x11e   :  { %315 = vsyncpa [#allocation6], 1 }
 0x11f   :  { %316 = vsyncpa [#allocation4], 1 }
 0x120   :  { %317 = vsyncpa [#allocation10], 1 }

</bundles_post_ra>
